<compile_context>
chip_gen: v7x
topology: tpu7x:2x2x1
jax: 0.10.0
libtpu: 0.0.40
codegen_flags: <defaults>
</compile_context>

<pallas_src>
import jax
import jax.numpy as jnp
from jax.experimental import pallas as pl
from jax.experimental.pallas import tpu as pltpu

HIDDEN1 = 128
HIDDEN2 = 64
HIDDEN2_PAD = 128          # zero-padded hidden2 -> lane-native fc2-N / fc3-K
DEFAULT_TB_MAX = 4096      # big tile amortizes ~0.35us per-grid-step overhead
MEGACORE_MIN_B = 1024      # once B is "large", keep >=2 grid steps (v7x 2 TCs)
VMEM_BUDGET = 24 << 20     # target working set, under the 32 MiB limit below


def _round_up(x, m):
    return ((x + m - 1) // m) * m


def _cdiv(a, b):
    return (a + b - 1) // b


def _mlp_kernel(x_ref, w1_ref, b1_ref, w2_ref, b2_ref, w3_ref, b3_ref, o_ref):
    # In-kernel f32 -> bf16 cast of the activation tile (saves a whole
    # wrapper-side cast pass over x in HBM; the VPU cast hides under the MXU).
    x = x_ref[...].astype(jnp.bfloat16)
    # fc1: bf16 x bf16 -> f32 MXU accumulate.
    h1 = jnp.dot(x, w1_ref[...], preferred_element_type=jnp.float32)
    # bf16 epilogue (bias + ReLU) feeds fc2 directly — halves VALU/vreg traffic
    # on v6e/v7x; still correct (just a slower VPU path) on v5e.
    h1 = jnp.maximum(h1.astype(jnp.bfloat16) + b1_ref[...], 0)
    # fc2 (output lanes padded 64->128; padded cols & bias are zero, ReLU(0)=0).
    h2 = jnp.dot(h1, w2_ref[...], preferred_element_type=jnp.float32)
    h2 = jnp.maximum(h2.astype(jnp.bfloat16) + b2_ref[...], 0)
    # fc3 (padded K rows of w3 are zero -> no contribution); final bias in f32.
    out = jnp.dot(h2, w3_ref[...], preferred_element_type=jnp.float32)
    o_ref[...] = (out + b3_ref[...]).astype(o_ref.dtype)


def prepare_params(params):
    """One-time parameter prep, hoisted out of the hot path.

    params: w1 (dim,128), b1 (1,128), w2 (128,64), b2 (1,64),
            w3 (64,num_layers), b3 (1,num_layers)   [weights stored (in, out)]
    Returns bf16 matmul weights, bf16 hidden biases, f32 final bias, with
    hidden2 zero-padded 64->128.
    """
    pad2 = HIDDEN2_PAD - HIDDEN2
    return {
        "w1": params["w1"].astype(jnp.bfloat16),
        "b1": params["b1"].astype(jnp.bfloat16),
        "w2": jnp.pad(params["w2"], ((0, 0), (0, pad2))).astype(jnp.bfloat16),
        "b2": jnp.pad(params["b2"], ((0, 0), (0, pad2))).astype(jnp.bfloat16),
        "w3": jnp.pad(params["w3"], ((0, pad2), (0, 0))).astype(jnp.bfloat16),
        "b3": params["b3"].astype(jnp.float32),
    }


def single_policy_net_forward(x, prepared, *, tb_max=DEFAULT_TB_MAX,
                              out_dtype=jnp.float32):
    """Fused 3-layer MLP forward.

    x: (B, dim) float32, prepared: output of prepare_params().
    returns {'policy': (B, num_layers) out_dtype}
    """
    B, dim = x.shape
    num_layers = prepared["b3"].shape[1]
    if B == 0:
        return {"policy": jnp.zeros((0, num_layers), out_dtype)}

    # --- batch-tile selection ---
    # VMEM cap: double-buffered f32 x tile + double-buffered out tile +
    # (TB,128) f32/bf16 intermediates; resident weights are tiny.
    row_bytes = 2 * dim * 4 + 2 * num_layers * 4 + 6 * HIDDEN1 * 4
    tb_cap = max(8, (VMEM_BUDGET // row_bytes) // 8 * 8)
    tb_hi = max(8, min(tb_max, tb_cap))

    # Split B into near-equal tiles (pad tail of at most a few rows per tile
    # instead of padding B up to a multiple of a huge tb).
    n_tiles = _cdiv(B, tb_hi)
    if B >= MEGACORE_MIN_B:
        n_tiles = max(n_tiles, 2)   # v7x: give both TensorCores a grid step
    tb = _round_up(_cdiv(B, n_tiles), 8)
    b_pad = n_tiles * tb

    x_in = x if b_pad == B else jnp.pad(x, ((0, b_pad - B), (0, 0)))

    # Weights/biases map to block (0,0) on every step -> never re-DMA'd; at
    # these sizes the default double buffer costs <100 KiB, so we keep the
    # default pipelining (single-buffering would only matter for huge dim).
    def _resident(shape):
        return pl.BlockSpec(shape, lambda i: (0, 0))

    out = pl.pallas_call(
        _mlp_kernel,
        out_shape=jax.ShapeDtypeStruct((b_pad, num_layers), out_dtype),
        grid=(n_tiles,),
        in_specs=[
            pl.BlockSpec((tb, dim), lambda i: (i, 0)),   # f32 x tile (pipelined)
            _resident((dim, HIDDEN1)),
            _resident((1, HIDDEN1)),
            _resident((HIDDEN1, HIDDEN2_PAD)),
            _resident((1, HIDDEN2_PAD)),
            _resident((HIDDEN2_PAD, num_layers)),
            _resident((1, num_layers)),
        ],
        out_specs=pl.BlockSpec((tb, num_layers), lambda i: (i, 0)),
        compiler_params=pltpu.CompilerParams(
            dimension_semantics=("parallel",),   # megacore-shardable batch axis
            vmem_limit_bytes=32 << 20,           # explicit, v7x-safe budget
        ),
    )(x_in, prepared["w1"], prepared["b1"], prepared["w2"], prepared["b2"],
      prepared["w3"], prepared["b3"])

    return {"policy": out[:B]}


def init_params(key, dim, num_layers):
    """Deterministic init mimicking nn.Linear's U(-1/sqrt(in), 1/sqrt(in))."""
    ks = jax.random.split(key, 6)

    def lin(kw, kb, fan_in, fan_out):
        bound = 1.0 / jnp.sqrt(float(fan_in))
        w = jax.random.uniform(kw, (fan_in, fan_out), jnp.float32, -bound, bound)
        b = jax.random.uniform(kb, (1, fan_out), jnp.float32, -bound, bound)
        return w, b

    w1, b1 = lin(ks[0], ks[1], dim, HIDDEN1)
    w2, b2 = lin(ks[2], ks[3], HIDDEN1, HIDDEN2)
    w3, b3 = lin(ks[4], ks[5], HIDDEN2, num_layers)
    return {"w1": w1, "b1": b1, "w2": w2, "b2": b2, "w3": w3, "b3": b3}


def _reference(x, p):
    h1 = jnp.maximum(x @ p["w1"] + p["b1"], 0.0)
    h2 = jnp.maximum(h1 @ p["w2"] + p["b2"], 0.0)
    return h2 @ p["w3"] + p["b3"]


if __name__ == "__main__":
    key = jax.random.PRNGKey(0)
    k_x, k_p = jax.random.split(key)

    batch, dim, num_layers = 8, 32, 8
    x = jax.random.normal(k_x, (batch, dim), jnp.float32)
    params = init_params(k_p, dim, num_layers)

    prepared = prepare_params(params)          # one-time prep, off the hot path
    out = single_policy_net_forward(x, prepared)
    policy = jax.block_until_ready(out["policy"])

    ref = _reference(x, params)  # f32 reference; kernel uses bf16 matmul/epilogue
    assert policy.shape == (batch, num_layers)
    assert jnp.allclose(policy, ref, atol=5e-2, rtol=5e-2)

    print("KERNEL_OK")
</pallas_src>

<mosaic_0001>
module attributes {stable_mosaic.version = 11 : i64} {
  func.func @_mlp_kernel(%arg0: i32, %arg1: memref<8x32xf32, #tpu.memory_space<vmem>>, %arg2: memref<32x128xbf16, #tpu.memory_space<vmem>>, %arg3: memref<1x128xbf16, #tpu.memory_space<vmem>>, %arg4: memref<128x128xbf16, #tpu.memory_space<vmem>>, %arg5: memref<1x128xbf16, #tpu.memory_space<vmem>>, %arg6: memref<128x8xbf16, #tpu.memory_space<vmem>>, %arg7: memref<1x8xf32, #tpu.memory_space<vmem>>, %arg8: memref<8x8xf32, #tpu.memory_space<vmem>>) attributes {dimension_semantics = [#tpu.dimension_semantics<parallel>], iteration_bounds = array<i64: 1>, scalar_prefetch = 0 : i64, scratch_operands = 0 : i64, tpu.core_type = #tpu.core_type<tc>, window_params = [{transform_indices = @transform_0, window_bounds = array<i64: 8, 32>}, {pipeline_mode = #tpu.pipeline_mode<synchronous>, transform_indices = @transform_1, window_bounds = array<i64: 32, 128>}, {pipeline_mode = #tpu.pipeline_mode<synchronous>, transform_indices = @transform_2, window_bounds = array<i64: 1, 128>}, {pipeline_mode = #tpu.pipeline_mode<synchronous>, transform_indices = @transform_3, window_bounds = array<i64: 128, 128>}, {pipeline_mode = #tpu.pipeline_mode<synchronous>, transform_indices = @transform_4, window_bounds = array<i64: 1, 128>}, {pipeline_mode = #tpu.pipeline_mode<synchronous>, transform_indices = @transform_5, window_bounds = array<i64: 128, 8>}, {pipeline_mode = #tpu.pipeline_mode<synchronous>, transform_indices = @transform_6, window_bounds = array<i64: 1, 8>}, {transform_indices = @transform_7, window_bounds = array<i64: 8, 8>}]} {
    %c0 = arith.constant 0 : index
    %c0_0 = arith.constant 0 : index
    %0 = vector.load %arg1[%c0, %c0_0] : memref<8x32xf32, #tpu.memory_space<vmem>>, vector<8x32xf32>
    %1 = arith.truncf %0 : vector<8x32xf32> to vector<8x32xbf16>
    %c0_1 = arith.constant 0 : index
    %c0_2 = arith.constant 0 : index
    %2 = vector.load %arg2[%c0_1, %c0_2] : memref<32x128xbf16, #tpu.memory_space<vmem>>, vector<32x128xbf16>
    %cst = arith.constant dense<0.000000e+00> : vector<8x128xf32>
    %3 = tpu.matmul %1, %2, %cst {dimension_numbers = #tpu.dot_dimension_numbers<[1], [0], [0], [1], [0, 0, 1, 1], [], []>} : vector<8x32xbf16>, vector<32x128xbf16>, vector<8x128xf32> -> vector<8x128xf32>
    %4 = arith.truncf %3 : vector<8x128xf32> to vector<8x128xbf16>
    %c0_3 = arith.constant 0 : index
    %c0_4 = arith.constant 0 : index
    %5 = vector.load %arg3[%c0_3, %c0_4] : memref<1x128xbf16, #tpu.memory_space<vmem>>, vector<1x128xbf16>
    %6 = vector.broadcast %5 : vector<1x128xbf16> to vector<8x128xbf16>
    %7 = arith.addf %4, %6 : vector<8x128xbf16>
    %cst_5 = arith.constant 0.000000e+00 : bf16
    %8 = vector.broadcast %cst_5 : bf16 to vector<8x128xbf16>
    %9 = arith.maximumf %7, %8 : vector<8x128xbf16>
    %c0_6 = arith.constant 0 : index
    %c0_7 = arith.constant 0 : index
    %10 = vector.load %arg4[%c0_6, %c0_7] : memref<128x128xbf16, #tpu.memory_space<vmem>>, vector<128x128xbf16>
    %cst_8 = arith.constant dense<0.000000e+00> : vector<8x128xf32>
    %11 = tpu.matmul %9, %10, %cst_8 {dimension_numbers = #tpu.dot_dimension_numbers<[1], [0], [0], [1], [0, 0, 1, 1], [], []>} : vector<8x128xbf16>, vector<128x128xbf16>, vector<8x128xf32> -> vector<8x128xf32>
    %12 = arith.truncf %11 : vector<8x128xf32> to vector<8x128xbf16>
    %c0_9 = arith.constant 0 : index
    %c0_10 = arith.constant 0 : index
    %13 = vector.load %arg5[%c0_9, %c0_10] : memref<1x128xbf16, #tpu.memory_space<vmem>>, vector<1x128xbf16>
    %14 = vector.broadcast %13 : vector<1x128xbf16> to vector<8x128xbf16>
    %15 = arith.addf %12, %14 : vector<8x128xbf16>
    %cst_11 = arith.constant 0.000000e+00 : bf16
    %16 = vector.broadcast %cst_11 : bf16 to vector<8x128xbf16>
    %17 = arith.maximumf %15, %16 : vector<8x128xbf16>
    %c0_12 = arith.constant 0 : index
    %c0_13 = arith.constant 0 : index
    %18 = vector.load %arg6[%c0_12, %c0_13] : memref<128x8xbf16, #tpu.memory_space<vmem>>, vector<128x8xbf16>
    %cst_14 = arith.constant dense<0.000000e+00> : vector<8x8xf32>
    %19 = tpu.matmul %17, %18, %cst_14 {dimension_numbers = #tpu.dot_dimension_numbers<[1], [0], [0], [1], [0, 0, 1, 1], [], []>} : vector<8x128xbf16>, vector<128x8xbf16>, vector<8x8xf32> -> vector<8x8xf32>
    %c0_15 = arith.constant 0 : index
    %c0_16 = arith.constant 0 : index
    %20 = vector.load %arg7[%c0_15, %c0_16] : memref<1x8xf32, #tpu.memory_space<vmem>>, vector<1x8xf32>
    %21 = vector.broadcast %20 : vector<1x8xf32> to vector<8x8xf32>
    %22 = arith.addf %19, %21 : vector<8x8xf32>
    %c0_17 = arith.constant 0 : index
    %c0_18 = arith.constant 0 : index
    %23 = vector.load %arg8[%c0_17, %c0_18] : memref<8x8xf32, #tpu.memory_space<vmem>>, vector<8x8xf32>
    tpu.vector_store %arg8[%c0_17, %c0_18], %22 {strides = array<i32>} : memref<8x8xf32, #tpu.memory_space<vmem>>, vector<8x8xf32>,
    return
  }
  func.func @transform_0(%arg0: i32) -> (i32, i32) {
    %c0_i32 = arith.constant 0 : i32
    %c0_i32_0 = arith.constant 0 : i32
    return %arg0, %c0_i32 : i32, i32
  }
  func.func @transform_1(%arg0: i32) -> (i32, i32) {
    %c0_i32 = arith.constant 0 : i32
    %c0_i32_0 = arith.constant 0 : i32
    %c0_i32_1 = arith.constant 0 : i32
    return %c0_i32, %c0_i32_0 : i32, i32
  }
  func.func @transform_2(%arg0: i32) -> (i32, i32) {
    %c0_i32 = arith.constant 0 : i32
    %c0_i32_0 = arith.constant 0 : i32
    %c0_i32_1 = arith.constant 0 : i32
    return %c0_i32, %c0_i32_0 : i32, i32
  }
  func.func @transform_3(%arg0: i32) -> (i32, i32) {
    %c0_i32 = arith.constant 0 : i32
    %c0_i32_0 = arith.constant 0 : i32
    %c0_i32_1 = arith.constant 0 : i32
    return %c0_i32, %c0_i32_0 : i32, i32
  }
  func.func @transform_4(%arg0: i32) -> (i32, i32) {
    %c0_i32 = arith.constant 0 : i32
    %c0_i32_0 = arith.constant 0 : i32
    %c0_i32_1 = arith.constant 0 : i32
    return %c0_i32, %c0_i32_0 : i32, i32
  }
  func.func @transform_5(%arg0: i32) -> (i32, i32) {
    %c0_i32 = arith.constant 0 : i32
    %c0_i32_0 = arith.constant 0 : i32
    %c0_i32_1 = arith.constant 0 : i32
    return %c0_i32, %c0_i32_0 : i32, i32
  }
  func.func @transform_6(%arg0: i32) -> (i32, i32) {
    %c0_i32 = arith.constant 0 : i32
    %c0_i32_0 = arith.constant 0 : i32
    %c0_i32_1 = arith.constant 0 : i32
    return %c0_i32, %c0_i32_0 : i32, i32
  }
  func.func @transform_7(%arg0: i32) -> (i32, i32) {
    %c0_i32 = arith.constant 0 : i32
    %c0_i32_0 = arith.constant 0 : i32
    return %arg0, %c0_i32 : i32, i32
  }
}

</mosaic_0001>

<bundles_post_ra>
// kernel: tpu_custom_call.1
= control target key start
LH: loop header
LB: loop body
LE: loop exit
PB: predicated region body
PF: predicated region fallthrough
CT: control target
= control target key end

     0   :  { %12 = vsyncpa [#allocation3], 0  ;;  %s675_s0 = inlined_call_operand.vmem [shape: f32[8,32], index: 0, kind: input, shape index: {}]   ;;  %s676_s1 = inlined_call_operand.hbm [shape: bf16[32,128], index: 1, kind: input, shape index: {}]   ;;  %s677_s2 = inlined_call_operand.vmem [shape: bf16[1,128], index: 2, kind: input, shape index: {}]   ;;  %s678_s3 = inlined_call_operand.vmem [shape: bf16[128,128], index: 3, kind: input, shape index: {}]   ;;  %s679_s4 = inlined_call_operand.vmem [shape: bf16[1,128], index: 4, kind: input, shape index: {}]   ;;  %s680_s5 = inlined_call_operand.vmem [shape: bf16[128,8], index: 5, kind: input, shape index: {}]   ;;  %s681_s6 = inlined_call_operand.vmem [shape: f32[1,8], index: 6, kind: input, shape index: {}]   ;;  %s682_s7 = inlined_call_operand.hbm [shape: f32[8,8], index: 7, kind: output, shape index: {}]  }
   0x1   :  { %13 = vsyncpa [#allocation4], 0  ;;  %s520_s24 = smov [#allocation2]   ;;  %s472_s28 = scalar_lea.hbm %s676_s1, 256 }
   0x2   :  { %s21_s25 = sshll.u32 %s520_s24, 4  ;;  %p473_p0 = scmp.ne.s32.totalorder %s676_s1, %s472_s28  ;;  %s22_s25 = int_to_ptr.vmem [resolvable:$true] %s21_s25 }
   0x3   :  { %p476_p1 = scmp.lt.u32.totalorder %s472_s28, %s676_s1 }
   0x5   :  { %p478_p2 = pnand %p476_p1, %p473_p0 }
   0x7   :  { %481 = shalt.err (!%p478_p2)
}
   0x8   :  { %s482_s10 = scalar_lea.vmem %s22_s25, 256  ;;  %p487_p4 = scmp.lt.s32.totalorder %s22_s25, %s22_s25 }
   0x9   :  { %p483_p3 = scmp.ne.s32.totalorder %s22_s25, %s482_s10  ;;  %p488_p5 = scmp.lt.s32.totalorder %s482_s10, %s482_s10 }
   0xb   :  { %p489_p6 = por %p488_p5, %p487_p4 }
   0xd   :  { %p490_p7 = pnand %p489_p6, %p483_p3 }
   0xf   :  { %493 = shalt.err (!%p490_p7)
}
  0x10   :  { %s521_s11 = smov 64   ;;  %s522_s12 = smov 4  }
  0x11   :  { %27 = dma.hbm_to_vmem [thread:$0]  %s676_s1, 256, %s22_s25, [#allocation3], %s521_s11, %s521_s11, %s522_s12  }
  0x12   :  { %516 = dma.done.wait [#allocation3], 256  }
  0x13   :  { %517 = vsyncadd [#allocation3], 4294967040  ;;  %v523_v0 = vmov 0.0   ;;  %vm524_vm0 = vmmov 0   ;;  %v454_v1 = vld [vmem:[#allocation2] sm:$0xff]   ;;  %v455_v2 = vld [vmem:[#allocation2 + $0x8] sm:$0xff]   ;;  %v109_v19 = vlaneseq }
  0x14   :  { %399 = vmatprep.subr.bf16.mxu0 %v523_v0  ;;  %403 = vmatprep.mubr.msk.bf16.mxu0 %vm524_vm0, %v523_v0  ;;  %v42_v3 = vld [vmem:[%s675_s0] sm:$0xff]  ;;  %v457_v6 = vld [vmem:[%s678_s3 + $0x8] sm:$0xff]   ;;  %vm60_vm1 = vcmask 261120   ;;  %v458_v7 = vld [vmem:[%s678_s3 + $0x10] sm:$0xff]   ;;  %v525_v31 = vmov 0   ;;  %vm341_vm2 = vcmask 64512  }
  0x15   :  { %407 = vmatprep.subr.bf16.mxu1 %v523_v0  ;;  %423 = vmatprep.mubr.msk.bf16.mxu1 %vm524_vm0, %v523_v0  ;;  %v456_v4 = vld [vmem:[%s678_s3] sm:$0xff]   ;;  %v43_v5 = vpack.c.bf16 %v42_v3, %v42_v3  ;;  %v459_v8 = vld [vmem:[%s678_s3 + $0x18] sm:$0xff]   ;;  %v461_v10 = vld [vmem:[%s678_s3 + $0x28] sm:$0xff]   ;;  %v110_v20 = vshrl.u32 %v109_v19, 7 }
  0x16   :  { %400 = vmatpush3.bf16.msra.mxu0 %v454_v1  ;;  %408 = vmatpush3.bf16.msra.mxu1 %v456_v4  ;;  %v460_v9 = vld [vmem:[%s678_s3 + $0x20] sm:$0xff]   ;;  %v462_v11 = vld [vmem:[%s678_s3 + $0x30] sm:$0xff]   ;;  %v463_v12 = vld [vmem:[%s678_s3 + $0x38] sm:$0xff]  }
  0x17   :  { %401 = vmatprep.subr.bf16.mxu0 %v523_v0  ;;  %409 = vmatprep.subr.bf16.mxu1 %v523_v0  ;;  %v464_v13 = vld [vmem:[%s680_s5] sm:$0xff]   ;;  %v465_v14 = vld [vmem:[%s680_s5 + $0x8] sm:$0xff]   ;;  %v466_v15 = vld [vmem:[%s680_s5 + $0x10] sm:$0xff]   ;;  %v111_v23 = vsub.s32 0, %v110_v20 }
  0x18   :  { %v467_v16 = vld [vmem:[%s680_s5 + $0x18] sm:$0xff]   ;;  %v468_v17 = vld [vmem:[%s680_s5 + $0x20] sm:$0xff]   ;;  %v469_v18 = vld [vmem:[%s680_s5 + $0x28] sm:$0xff]  }
  0x19   :  { %v105_v21 = vld [vmem:[%s677_s2] sm:$0x1]  ;;  %v470_v33 = vld [vmem:[%s680_s5 + $0x30] sm:$0xff]   ;;  %v471_v34 = vld [vmem:[%s680_s5 + $0x38] sm:$0xff]   ;;  %s526_s5 = smov [#allocation5]  }
  0x1a   :  { %402 = vmatpush3.bf16.msra.mxu0 %v455_v2  ;;  %410 = vmatpush3.bf16.msra.mxu1 %v457_v6  ;;  %v107_v22 = vpack.i.b16 %v105_v21, %v105_v21  ;;  %v220_v35 = vld [vmem:[%s679_s4] sm:$0x1]  ;;  %s349_s26 = sshll.u32 %s526_s5, 4  ;;  %s350_s26 = int_to_ptr.vmem [resolvable:$true] %s349_s26 }
  0x1b   :  { %427 = vmatprep.subr.bf16.mxu0 %v523_v0  ;;  %411 = vmatprep.subr.bf16.mxu1 %v523_v0  ;;  %v222_v36 = vpack.i.b16 %v220_v35, %v220_v35  ;;  %v369_v45 = vld [vmem:[%s681_s6] ss:$0 sm:$0xff]  ;;  %s494_s4 = scalar_lea.vmem %s350_s26, 128  ;;  %p499_p9 = scmp.lt.s32.totalorder %s350_s26, %s350_s26 }
  0x1c   :  { %v112_v24 = vrot.slane %v107_v22, %v111_v23  ;;  %p495_p8 = scmp.ne.s32.totalorder %s350_s26, %s494_s4  ;;  %p500_p10 = scmp.lt.s32.totalorder %s494_s4, %s494_s4 }
  0x1d   :  { %404 = vmatmul.mubr.msk.bf16.vlgmr.msra.gmra.mrb[0].mxu0 %vm60_vm1, %v43_v5  ;;  %v227_v37 = vrot.slane %v222_v36, %v111_v23 }
  0x1e   :  { %443 = vmatprep.mubr.msk.bf16.mxu0 %vm524_vm0, %v523_v0  ;;  %412 = vmatpush3.bf16.msra.mxu1 %v458_v7  ;;  %p501_p11 = por %p500_p10, %p499_p9 }
  0x1f   :  { %413 = vmatprep.subr.bf16.mxu1 %v523_v0  ;;  %428 = vmatpush3.bf16.msra.mxu0 %v464_v13 }
  0x20   :  { %429 = vmatprep.subr.bf16.mxu0 %v523_v0  ;;  %p502_p12 = pnand %p501_p11, %p495_p8 }
  0x22   :  { %414 = vmatpush3.bf16.msra.mxu1 %v459_v8 }
  0x23   :  { %415 = vmatprep.subr.bf16.mxu1 %v523_v0  ;;  %430 = vmatpush3.bf16.msra.mxu0 %v465_v14 }
  0x24   :  { %431 = vmatprep.subr.bf16.mxu0 %v523_v0 }
  0x26   :  { %416 = vmatpush3.bf16.msra.mxu1 %v460_v9 }
  0x27   :  { %417 = vmatprep.subr.bf16.mxu1 %v523_v0  ;;  %432 = vmatpush3.bf16.msra.mxu0 %v466_v15 }
  0x28   :  { %433 = vmatprep.subr.bf16.mxu0 %v523_v0 }
  0x2a   :  { %418 = vmatpush3.bf16.msra.mxu1 %v461_v10 }
  0x2b   :  { %419 = vmatprep.subr.bf16.mxu1 %v523_v0  ;;  %434 = vmatpush3.bf16.msra.mxu0 %v467_v16 }
  0x2c   :  { %435 = vmatprep.subr.bf16.mxu0 %v523_v0 }
  0x2e   :  { %420 = vmatpush3.bf16.msra.mxu1 %v462_v11 }
  0x2f   :  { %421 = vmatprep.subr.bf16.mxu1 %v523_v0  ;;  %436 = vmatpush3.bf16.msra.mxu0 %v468_v17 }
  0x30   :  { %437 = vmatprep.subr.bf16.mxu0 %v523_v0 }
  0x32   :  { %422 = vmatpush3.bf16.msra.mxu1 %v463_v12 }
  0x33   :  { %438 = vmatpush3.bf16.msra.mxu0 %v469_v18 }
  0x34   :  { %439 = vmatprep.subr.bf16.mxu0 %v523_v0 }
  0x37   :  { %440 = vmatpush3.bf16.msra.mxu0 %v470_v33 }
  0x38   :  { %441 = vmatprep.subr.bf16.mxu0 %v523_v0 }
  0x3b   :  { %442 = vmatpush3.bf16.msra.mxu0 %v471_v34 }
  0xf0   :  { %v98_v25 = vpop.f32.mrb[0].mxu0 }
  0xf1   :  { %v104_v26 = vpack.c.bf16 %v98_v25, %v98_v25  ;;  %v405_v27 = vpop.f32.mrb[1].mxu0 }
  0xf2   :  { %v101_v28 = vpop.f32.mrb[2].mxu0 }
  0xf3   :  { %v113_v29 = vadd.bf16 %v112_v24, %v104_v26  ;;  %v406_v30 = vpop.f32.mrb[3].mxu0 }
  0xf5   :  { %v114_v32 = vmax.bf16 %v525_v31, %v113_v29 }
  0xf7   :  { %424 = vmatmul.mubr.bf16.vlgmr.msra.gmra.mrb[0].mxu1 %v114_v32 }
 0x1ca   :  { %v213_v38 = vpop.f32.mrb[0].mxu1 }
 0x1cb   :  { %v219_v39 = vpack.c.bf16 %v213_v38, %v213_v38  ;;  %v425_v40 = vpop.f32.mrb[1].mxu1 }
 0x1cc   :  { %v216_v41 = vpop.f32.mrb[2].mxu1 }
 0x1cd   :  { %v228_v42 = vadd.bf16 %v227_v37, %v219_v39  ;;  %v426_v43 = vpop.f32.mrb[3].mxu1 }
 0x1cf   :  { %v229_v44 = vmax.bf16 %v525_v31, %v228_v42 }
 0x1d1   :  { %444 = vmatmul.mubr.bf16.vlgmr.msra.gmra.mrb[4].mxu0 %v229_v44 }
 0x2a4   :  { %v335_v46 = vpop.f32.mrb[4].mxu0 }
 0x2a5   :  { %v336_v47 = vadd.f32 %v369_v45, %v335_v46  ;;  %v445_v48 = vpop.f32.mrb[5].mxu0 }
 0x2a6   :  { %v338_v49 = vpop.f32.mrb[6].mxu0 }
 0x2a7   :  { %v446_v50 = vpop.f32.mrb[7].mxu0  ;;  %342 = vst.msk [vmem:[#allocation5] sm:$0xff] %vm341_vm2, %v336_v47 }
 0x2a8   :  { %505 = shalt.err (!%p502_p12)
}
 0x2a9   :  { %s506_s6 = scalar_lea.hbm %s682_s7, 128 }
 0x2aa   :  { %p507_p13 = scmp.ne.s32.totalorder %s682_s7, %s506_s6  ;;  %p510_p0 = scmp.lt.u32.totalorder %s506_s6, %s682_s7 }
 0x2ac   :  { %p512_p1 = pnand %p510_p0, %p507_p13 }
 0x2ae   :  { %515 = shalt.err (!%p512_p1)
}
 0x2af   :  { %352 = dma.vmem_to_hbm [thread:$0]  %s350_s26, 128, %s682_s7, [#allocation4]  }
 0x2b0   :  { %518 = dma.done.wait [#allocation4], 128  }
 0x2b1   :  { %519 = vsyncadd [#allocation4], 4294967168 }
 0x2b2   :  { %356 = vsyncpa [#allocation3], 1 }
 0x2b3   :  { %357 = vsyncpa [#allocation4], 1 }

</bundles_post_ra>
